<compile_context>
chip_gen: v6e
topology: v6e:2x2x1
jax: 0.10.0
libtpu: 0.0.40
codegen_flags: <defaults>
</compile_context>

<pallas_src>
import functools

import jax
import jax.numpy as jnp
from jax.experimental import pallas as pl
from jax.experimental.pallas import tpu as pltpu


# ----------------------------------------------------------------------------
# Fused Pallas kernel
# ----------------------------------------------------------------------------
def _pcgnn_fused_kernel(mask_ref, feat_ref, wclf_ref, wcomb_ref, *rest,
                        num_relations, feat_dim):
    adj_refs = rest[:num_relations]
    emb_ref = rest[num_relations]
    log_ref = rest[num_relations + 1]

    idx = mask_ref[...]                                    # (B, 1) int32
    batch = idx.shape[0]
    feat_aug = feat_ref[...]                               # (N, D+1), last col == 1
    n_nodes = feat_aug.shape[0]

    # One-hot selection of the batch-center rows (VPU iota + compare).
    lane_ids = jax.lax.broadcasted_iota(jnp.int32, (batch, n_nodes), 1)
    onehot = (lane_ids == idx).astype(jnp.float32)         # (B, N)

    # Gather center features on the MXU; last column is exactly 1 (bias hook).
    self_aug = jnp.dot(onehot, feat_aug,
                       preferred_element_type=jnp.float32)  # (B, D+1)

    # Label-aware classifier: bias folded into the last weight row, output is a
    # lane-dense (B, 128) slab (unmasked full-lane store).
    log_ref[...] = jnp.dot(self_aug, wclf_ref[...],
                           preferred_element_type=jnp.float32).astype(log_ref.dtype)

    # Gather the batch rows of every relation's adjacency and stack them, so
    # the large N-reduction is ONE (R*B, N) @ (N, D+1) MXU call.
    batch_adj = jnp.concatenate(
        [jnp.dot(onehot, a_ref[...], preferred_element_type=jnp.float32)
         for a_ref in adj_refs], axis=0)                   # (R*B, N)
    agg_aug = jnp.dot(batch_adj, feat_aug,
                      preferred_element_type=jnp.float32)  # (R*B, D+1)

    # Mean normalization: the degree comes from the ones column of feat_aug
    # (no XLU row-sum); reciprocal goes to the EUP slot.
    deg = jnp.maximum(agg_aug[:, feat_dim:feat_dim + 1], 1.0)
    agg = agg_aug[:, :feat_dim] * pl.reciprocal(deg, approx=True)   # (R*B, D)

    # Combine projection: accumulate against row-blocks of W_comb instead of
    # materializing concat([self, agg_1..agg_R]).
    w_comb = wcomb_ref[...]                                # ((R+1)*D, OUT_PAD)
    acc = jnp.dot(self_aug[:, :feat_dim], w_comb[:feat_dim, :],
                  preferred_element_type=jnp.float32)
    for r in range(num_relations):
        acc += jnp.dot(agg[r * batch:(r + 1) * batch, :],
                       w_comb[(r + 1) * feat_dim:(r + 2) * feat_dim, :],
                       preferred_element_type=jnp.float32)
    emb_ref[...] = jnp.maximum(acc, 0.0).astype(emb_ref.dtype)


def _full_spec(shape):
    # Single whole-array block (grid=()); full-extent dims satisfy the (8,128)
    # divisibility rule.
    return pl.BlockSpec(shape, lambda: tuple(0 for _ in shape))


def _round_up(x, m):
    return ((x + m - 1) // m) * m


def _pcgnn_pallas_call(mask2d, feats_aug, w_clf_pad, w_comb_pad, adj_list):
    batch = mask2d.shape[0]
    n_nodes, d_aug = feats_aug.shape
    feat_dim = d_aug - 1
    num_relations = len(adj_list)
    out_pad = w_comb_pad.shape[1]
    clf_pad = w_clf_pad.shape[1]

    in_specs = [
        _full_spec((batch, 1)),                             # batch_mask indices
        _full_spec((n_nodes, d_aug)),                       # features + ones col
        _full_spec((d_aug, clf_pad)),                       # clf weight (+bias row)
        _full_spec(((num_relations + 1) * feat_dim, out_pad)),  # combine weight
    ] + [_full_spec((n_nodes, n_nodes)) for _ in range(num_relations)]

    out_shape = (jax.ShapeDtypeStruct((batch, out_pad), jnp.float32),
                 jax.ShapeDtypeStruct((batch, clf_pad), jnp.float32))
    out_specs = (_full_spec((batch, out_pad)), _full_spec((batch, clf_pad)))

    kernel = functools.partial(_pcgnn_fused_kernel,
                               num_relations=num_relations, feat_dim=feat_dim)
    return pl.pallas_call(
        kernel,
        out_shape=out_shape,
        in_specs=in_specs,
        out_specs=out_specs,
        compiler_params=pltpu.CompilerParams(
            # Whole-array blocks; explicit budget so the v7x (64 MiB physical /
            # 32 MiB scoped) VMEM limit is auditable. Demo shapes use < 1 MiB.
            vmem_limit_bytes=32 * 1024 * 1024),
    )(mask2d, feats_aug, w_clf_pad, w_comb_pad, *adj_list)


# ----------------------------------------------------------------------------
# GNNStack (num_layers == 1, model_type == 'PCGNN')
# ----------------------------------------------------------------------------
class GNNStackPallas:
    def __init__(self, input_dim, hidden_dim, output_dim, num_classes=2,
                 num_layers=1, num_relations=2, seed=0):
        assert num_layers == 1, "reference module only implements num_layers == 1"
        del hidden_dim  # unused by the single-layer PCGNN path
        self.input_dim = input_dim
        self.output_dim = output_dim
        self.num_classes = num_classes
        self.num_relations = num_relations

        key = jax.random.PRNGKey(seed)
        k1, k2, k3, k4, k5 = jax.random.split(key, 5)
        # InterAgg label-aware classifier: Linear(input_dim, 2) with bias.
        self.label_clf_w = (jax.random.normal(k1, (input_dim, 2), jnp.float32)
                            * (1.0 / jnp.sqrt(input_dim)))
        self.label_clf_b = jax.random.normal(k2, (2,), jnp.float32) * 0.01
        # InterAgg combine weight: ((R+1)*input_dim, output_dim), no bias.
        comb_in = (num_relations + 1) * input_dim
        self.combine_w = (jax.random.normal(k3, (comb_in, output_dim), jnp.float32)
                          * (1.0 / jnp.sqrt(comb_in)))
        # final_proj: Linear(output_dim, num_classes) -- used only in loss/test,
        # not in forward; kept for completeness.
        self.final_proj_w = (jax.random.normal(k4, (output_dim, num_classes),
                                               jnp.float32)
                             * (1.0 / jnp.sqrt(output_dim)))
        self.final_proj_b = jax.random.normal(k5, (num_classes,), jnp.float32) * 0.01

        # Kernel-side padded / folded parameters (built once):
        #  - bias folded as an extra weight row (consumed by the ones column)
        #  - output dims padded to 128 lanes for unmasked full-lane stores
        self.out_pad = _round_up(output_dim, 128)
        self.clf_pad = _round_up(2, 128)
        w_clf_aug = jnp.concatenate([self.label_clf_w, self.label_clf_b[None, :]],
                                    axis=0)                       # (D+1, 2)
        self.w_clf_pad = (jnp.zeros((input_dim + 1, self.clf_pad), jnp.float32)
                          .at[:, :2].set(w_clf_aug))
        self.w_comb_pad = (jnp.zeros((comb_in, self.out_pad), jnp.float32)
                           .at[:, :output_dim].set(self.combine_w))

    def forward(self, features, labels, batch_mask, train_pos_mask, adj_lists,
                train_flag=True):
        """
        features   : (N, D) float32
        labels     : (N,)  int32   (unused: pick&choose filtering not provided)
        batch_mask : (B,) int32 indices of batch-center nodes
        adj_lists  : list of (N, N) float32 dense adjacency, one per relation
        returns (embeds (B, out_dim), logits (B, 2))
        """
        del labels, train_pos_mask, train_flag  # TODO(synk): pick&choose filtering
        n_nodes = features.shape[0]
        batch = batch_mask.shape[0]

        # Ones column: per-row neighbor degree AND the clf bias both fall out of
        # the MXU matmuls inside the kernel (single cheap pad, fused under jit).
        feats_aug = jnp.concatenate(
            [features.astype(jnp.float32), jnp.ones((n_nodes, 1), jnp.float32)],
            axis=1)
        mask2d = batch_mask.astype(jnp.int32).reshape(batch, 1)

        emb_pad, log_pad = _pcgnn_pallas_call(mask2d, feats_aug, self.w_clf_pad,
                                              self.w_comb_pad, list(adj_lists))
        embeds = emb_pad[:, :self.output_dim]
        logits = log_pad[:, :2]
        return embeds, logits


# ----------------------------------------------------------------------------
# Demo
# ----------------------------------------------------------------------------
if __name__ == "__main__":
    N = 64            # number of graph nodes
    D = 16            # input feature dim
    OUT = 32          # output embedding dim
    B = 8             # batch of center nodes
    R = 2             # number of relations

    key = jax.random.PRNGKey(0)
    kf, ka1, ka2, kl = jax.random.split(key, 4)

    features = jax.random.normal(kf, (N, D), jnp.float32)
    labels = jax.random.randint(kl, (N,), 0, 2, jnp.int32)
    batch_mask = jnp.arange(B, dtype=jnp.int32)            # first B nodes as batch
    train_pos_mask = jnp.where(labels == 1, 1, 0)

    # Dense random adjacency per relation (self-loops included).
    adj_lists = []
    for k in (ka1, ka2):
        a = (jax.random.uniform(k, (N, N)) < 0.1).astype(jnp.float32)
        a = jnp.clip(a + jnp.eye(N, dtype=jnp.float32), 0.0, 1.0)
        adj_lists.append(a)

    model = GNNStackPallas(input_dim=D, hidden_dim=OUT, output_dim=OUT,
                           num_classes=2, num_layers=1, num_relations=R, seed=0)

    fwd = jax.jit(model.forward)
    embeds, logits = fwd(features, labels, batch_mask, train_pos_mask, adj_lists)
    jax.block_until_ready((embeds, logits))

    # Pure-JAX reference (same math, full f32) -- loose tolerance covers MXU
    # default-precision matmuls and the approximate reciprocal.
    self_feats = features[batch_mask]
    ref_logits = self_feats @ model.label_clf_w + model.label_clf_b
    aggs = []
    for a in adj_lists:
        ba = a[batch_mask]
        deg = jnp.maximum(ba.sum(axis=1, keepdims=True), 1.0)
        aggs.append((ba @ features) / deg)
    cat = jnp.concatenate([self_feats] + aggs, axis=1)
    ref_embeds = jax.nn.relu(cat @ model.combine_w)

    assert embeds.shape == (B, OUT)
    assert logits.shape == (B, 2)
    assert float(jnp.max(jnp.abs(embeds - ref_embeds))) < 1e-1
    assert float(jnp.max(jnp.abs(logits - ref_logits))) < 1e-1
    print("KERNEL_OK")
</pallas_src>

<mosaic_0001>
module attributes {stable_mosaic.version = 11 : i64} {
  func.func @_pcgnn_fused_kernel(%arg0: memref<8x1xi32, #tpu.memory_space<vmem>>, %arg1: memref<64x17xf32, #tpu.memory_space<vmem>>, %arg2: memref<17x128xf32, #tpu.memory_space<vmem>>, %arg3: memref<48x128xf32, #tpu.memory_space<vmem>>, %arg4: memref<64x64xf32, #tpu.memory_space<vmem>>, %arg5: memref<64x64xf32, #tpu.memory_space<vmem>>, %arg6: memref<8x128xf32, #tpu.memory_space<vmem>>, %arg7: memref<8x128xf32, #tpu.memory_space<vmem>>) attributes {dimension_semantics = [], scalar_prefetch = 0 : i64, scratch_operands = 0 : i64, tpu.core_type = #tpu.core_type<tc>} {
    %c0 = arith.constant 0 : index
    %c0_0 = arith.constant 0 : index
    %0 = vector.load %arg0[%c0, %c0_0] : memref<8x1xi32, #tpu.memory_space<vmem>>, vector<8x1xi32>
    %c0_1 = arith.constant 0 : index
    %c0_2 = arith.constant 0 : index
    %1 = vector.load %arg1[%c0_1, %c0_2] : memref<64x17xf32, #tpu.memory_space<vmem>>, vector<64x17xf32>
    %2 = tpu.iota {dimensions = array<i32: 1>} : vector<8x64xi32>
    %3 = vector.broadcast %0 : vector<8x1xi32> to vector<8x64xi32>
    %4 = arith.cmpi eq, %2, %3 : vector<8x64xi32>
    %5 = arith.extui %4 : vector<8x64xi1> to vector<8x64xi32>
    %6 = arith.sitofp %5 : vector<8x64xi32> to vector<8x64xf32>
    %cst = arith.constant dense<0.000000e+00> : vector<8x17xf32>
    %7 = tpu.matmul %6, %1, %cst {dimension_numbers = #tpu.dot_dimension_numbers<[1], [0], [0], [1], [0, 0, 1, 1], [], []>} : vector<8x64xf32>, vector<64x17xf32>, vector<8x17xf32> -> vector<8x17xf32>
    %c0_3 = arith.constant 0 : index
    %c0_4 = arith.constant 0 : index
    %8 = vector.load %arg2[%c0_3, %c0_4] : memref<17x128xf32, #tpu.memory_space<vmem>>, vector<17x128xf32>
    %cst_5 = arith.constant dense<0.000000e+00> : vector<8x128xf32>
    %9 = tpu.matmul %7, %8, %cst_5 {dimension_numbers = #tpu.dot_dimension_numbers<[1], [0], [0], [1], [0, 0, 1, 1], [], []>} : vector<8x17xf32>, vector<17x128xf32>, vector<8x128xf32> -> vector<8x128xf32>
    %c0_6 = arith.constant 0 : index
    %c0_7 = arith.constant 0 : index
    %10 = vector.load %arg7[%c0_6, %c0_7] : memref<8x128xf32, #tpu.memory_space<vmem>>, vector<8x128xf32>
    tpu.vector_store %arg7[%c0_6, %c0_7], %9 {strides = array<i32>} : memref<8x128xf32, #tpu.memory_space<vmem>>, vector<8x128xf32>,
    %c0_8 = arith.constant 0 : index
    %c0_9 = arith.constant 0 : index
    %11 = vector.load %arg4[%c0_8, %c0_9] : memref<64x64xf32, #tpu.memory_space<vmem>>, vector<64x64xf32>
    %cst_10 = arith.constant dense<0.000000e+00> : vector<8x64xf32>
    %12 = tpu.matmul %6, %11, %cst_10 {dimension_numbers = #tpu.dot_dimension_numbers<[1], [0], [0], [1], [0, 0, 1, 1], [], []>} : vector<8x64xf32>, vector<64x64xf32>, vector<8x64xf32> -> vector<8x64xf32>
    %c0_11 = arith.constant 0 : index
    %c0_12 = arith.constant 0 : index
    %13 = vector.load %arg5[%c0_11, %c0_12] : memref<64x64xf32, #tpu.memory_space<vmem>>, vector<64x64xf32>
    %cst_13 = arith.constant dense<0.000000e+00> : vector<8x64xf32>
    %14 = tpu.matmul %6, %13, %cst_13 {dimension_numbers = #tpu.dot_dimension_numbers<[1], [0], [0], [1], [0, 0, 1, 1], [], []>} : vector<8x64xf32>, vector<64x64xf32>, vector<8x64xf32> -> vector<8x64xf32>
    %15 = tpu.concatenate %12, %14 in 0 : vector<8x64xf32>, vector<8x64xf32> -> vector<16x64xf32>
    %cst_14 = arith.constant dense<0.000000e+00> : vector<16x17xf32>
    %16 = tpu.matmul %15, %1, %cst_14 {dimension_numbers = #tpu.dot_dimension_numbers<[1], [0], [0], [1], [0, 0, 1, 1], [], []>} : vector<16x64xf32>, vector<64x17xf32>, vector<16x17xf32> -> vector<16x17xf32>
    %17 = vector.extract_strided_slice %16 {offsets = [0, 16], sizes = [16, 1], strides = [1, 1]} : vector<16x17xf32> to vector<16x1xf32>
    %cst_15 = arith.constant 1.000000e+00 : f32
    %18 = vector.broadcast %cst_15 : f32 to vector<16x1xf32>
    %19 = arith.maximumf %17, %18 : vector<16x1xf32>
    %20 = vector.extract_strided_slice %16 {offsets = [0, 0], sizes = [16, 16], strides = [1, 1]} : vector<16x17xf32> to vector<16x16xf32>
    %21 = tpu.reciprocal %19 {approx = true} : vector<16x1xf32> -> vector<16x1xf32>
    %22 = vector.broadcast %21 : vector<16x1xf32> to vector<16x16xf32>
    %23 = arith.mulf %20, %22 : vector<16x16xf32>
    %c0_16 = arith.constant 0 : index
    %c0_17 = arith.constant 0 : index
    %24 = vector.load %arg3[%c0_16, %c0_17] : memref<48x128xf32, #tpu.memory_space<vmem>>, vector<48x128xf32>
    %25 = vector.extract_strided_slice %7 {offsets = [0, 0], sizes = [8, 16], strides = [1, 1]} : vector<8x17xf32> to vector<8x16xf32>
    %26 = vector.extract_strided_slice %24 {offsets = [0, 0], sizes = [16, 128], strides = [1, 1]} : vector<48x128xf32> to vector<16x128xf32>
    %cst_18 = arith.constant dense<0.000000e+00> : vector<8x128xf32>
    %27 = tpu.matmul %25, %26, %cst_18 {dimension_numbers = #tpu.dot_dimension_numbers<[1], [0], [0], [1], [0, 0, 1, 1], [], []>} : vector<8x16xf32>, vector<16x128xf32>, vector<8x128xf32> -> vector<8x128xf32>
    %28 = vector.extract_strided_slice %23 {offsets = [0, 0], sizes = [8, 16], strides = [1, 1]} : vector<16x16xf32> to vector<8x16xf32>
    %29 = vector.extract_strided_slice %24 {offsets = [16, 0], sizes = [16, 128], strides = [1, 1]} : vector<48x128xf32> to vector<16x128xf32>
    %cst_19 = arith.constant dense<0.000000e+00> : vector<8x128xf32>
    %30 = tpu.matmul %28, %29, %cst_19 {dimension_numbers = #tpu.dot_dimension_numbers<[1], [0], [0], [1], [0, 0, 1, 1], [], []>} : vector<8x16xf32>, vector<16x128xf32>, vector<8x128xf32> -> vector<8x128xf32>
    %31 = arith.addf %27, %30 : vector<8x128xf32>
    %32 = vector.extract_strided_slice %23 {offsets = [8, 0], sizes = [8, 16], strides = [1, 1]} : vector<16x16xf32> to vector<8x16xf32>
    %33 = vector.extract_strided_slice %24 {offsets = [32, 0], sizes = [16, 128], strides = [1, 1]} : vector<48x128xf32> to vector<16x128xf32>
    %cst_20 = arith.constant dense<0.000000e+00> : vector<8x128xf32>
    %34 = tpu.matmul %32, %33, %cst_20 {dimension_numbers = #tpu.dot_dimension_numbers<[1], [0], [0], [1], [0, 0, 1, 1], [], []>} : vector<8x16xf32>, vector<16x128xf32>, vector<8x128xf32> -> vector<8x128xf32>
    %35 = arith.addf %31, %34 : vector<8x128xf32>
    %cst_21 = arith.constant 0.000000e+00 : f32
    %36 = vector.broadcast %cst_21 : f32 to vector<8x128xf32>
    %37 = arith.maximumf %35, %36 : vector<8x128xf32>
    %c0_22 = arith.constant 0 : index
    %c0_23 = arith.constant 0 : index
    %38 = vector.load %arg6[%c0_22, %c0_23] : memref<8x128xf32, #tpu.memory_space<vmem>>, vector<8x128xf32>
    tpu.vector_store %arg6[%c0_22, %c0_23], %37 {strides = array<i32>} : memref<8x128xf32, #tpu.memory_space<vmem>>, vector<8x128xf32>,
    return
  }
}

</mosaic_0001>

<bundles_post_ra>
// kernel: forward.1
= control target key start
LH: loop header
LB: loop body
LE: loop exit
PB: predicated region body
PF: predicated region fallthrough
CT: control target
= control target key end

     0   :  { %v899_v2 = vmov 0   ;;  %v900_v3 = vmov 0.0   ;;  %vm901_vm0 = vmmov 0   ;;  %s1149_s0 = inlined_call_operand.vmem [shape: s32[8,1], index: 0, kind: input, shape index: {}]   ;;  %s1150_s1 = inlined_call_operand.vmem [shape: f32[64,17], index: 1, kind: input, shape index: {}]   ;;  %s1151_s2 = inlined_call_operand.vmem [shape: f32[17,128], index: 2, kind: input, shape index: {}]   ;;  %s1152_s3 = inlined_call_operand.vmem [shape: f32[48,128], index: 3, kind: input, shape index: {}]   ;;  %s1153_s4 = inlined_call_operand.vmem [shape: f32[64,64], index: 4, kind: input, shape index: {}]   ;;  %s1154_s5 = inlined_call_operand.vmem [shape: f32[64,64], index: 5, kind: input, shape index: {}]   ;;  %s1155_s6 = inlined_call_operand.hbm [shape: f32[8,128], index: 6, kind: output, shape index: {0}]   ;;  %s1156_s7 = inlined_call_operand.vmem [shape: f32[8,128], index: 7, kind: output, shape index: {1}]  }
   0x1   :  { %v26_v0 = vld [vmem:[%s1149_s0] sm:$0xff]  ;;  %v950_v1 = vld [vmem:[%s1150_s1 + $0x38] sm:$0xff]  ;;  %870 = vset.pattern.permute.xlu0 %v899_v2  ;;  %759 = vmatprep.subr.mxu0 %v900_v3  ;;  %v956_v4 = vld [vmem:[%s1150_s1 + $0x30] sm:$0xff] }
   0x2   :  { %38 = vperm.xlu0 %870, %v26_v0   ;;  %760 = vmatpush3.msra.mxu0 %v950_v1  ;;  %v963_v5 = vld [vmem:[%s1150_s1 + $0x28] sm:$0xff] }
   0x3   :  { %761 = vmatprep.subr.mxu0 %v900_v3  ;;  %775 = vmatprep.mubr.msk.f32.mxu0 %vm901_vm0, %v900_v3 }
   0x4   :  { %13 = vsyncpa [#allocation3], 0  ;;  %762 = vmatpush3.msra.mxu0 %v956_v4  ;;  %778 = vmatprep.subr.mxu1 %v900_v3  ;;  %v973_v6 = vld [vmem:[%s1150_s1 + $0x20] sm:$0xff]  ;;  %v982_v7 = vld [vmem:[%s1150_s1 + $0x18] sm:$0xff]  ;;  %vm124_vm1 = vcmask 1040384   ;;  %v35_v14 = vlaneseq  ;;  %vm43_vm2 = vcmask 523264  }
   0x5   :  { %763 = vmatprep.subr.mxu0 %v900_v3  ;;  %784 = vmatprep.mubr.msk.f32.mxu1 %vm901_vm0, %v900_v3  ;;  %v989_v8 = vld [vmem:[%s1150_s1 + $0x10] sm:$0xff]  ;;  %v996_v9 = vld [vmem:[%s1150_s1 + $0x8] sm:$0xff]  ;;  %v1003_v10 = vld [vmem:[%s1150_s1] sm:$0xff]  ;;  %vm120_vm4 = vcmask 138240   ;;  %v902_v42 = vmov 16   ;;  %vm458_vm5 = vcmask 130048  }
   0x6   :  { %764 = vmatpush3.msra.mxu0 %v963_v5  ;;  %v119_v11 = vld [vmem:[%s1151_s2 + $0x10] sm:$0x1]  ;;  %v118_v12 = vld [vmem:[%s1151_s2 + $0x8] sm:$0xff]  ;;  %v117_v13 = vld [vmem:[%s1151_s2] sm:$0xff]  ;;  %v36_v15 = vand.u32 127, %v35_v14  ;;  %872 = vset.pattern.permute.xlu1 %v902_v42  ;;  %s903_s15 = smov [#allocation2]  }
   0x7   :  { %765 = vmatprep.subr.mxu0 %v900_v3  ;;  %779 = vmatpush3.msk.msra.mxu1 %vm124_vm1, %v119_v11  ;;  %v284_v17 = vld [vmem:[%s1154_s5 + $0x38] sm:$0xff]  ;;  %v283_v19 = vld [vmem:[%s1154_s5 + $0x30] sm:$0xff]  ;;  %v282_v20 = vld [vmem:[%s1154_s5 + $0x28] sm:$0xff] }
   0x8   :  { %766 = vmatpush3.msra.mxu0 %v973_v6  ;;  %780 = vmatprep.subr.mxu1 %v900_v3  ;;  %v281_v21 = vld [vmem:[%s1154_s5 + $0x20] sm:$0xff]  ;;  %v280_v22 = vld [vmem:[%s1154_s5 + $0x18] sm:$0xff]  ;;  %v279_v23 = vld [vmem:[%s1154_s5 + $0x10] sm:$0xff] }
   0x9   :  { %767 = vmatprep.subr.mxu0 %v900_v3  ;;  %781 = vmatpush3.msra.mxu1 %v118_v12  ;;  %v278_v24 = vld [vmem:[%s1154_s5 + $0x8] sm:$0xff]  ;;  %v277_v25 = vld [vmem:[%s1154_s5] sm:$0xff]  ;;  %v206_v26 = vld [vmem:[%s1153_s4 + $0x38] sm:$0xff]  ;;  %s686_s5 = sshll.u32 %s903_s15, 4  ;;  %s687_s5 = int_to_ptr.vmem [resolvable:$true] %s686_s5 }
   0xa   :  { %768 = vmatpush3.msra.mxu0 %v982_v7  ;;  %782 = vmatprep.subr.mxu1 %v900_v3  ;;  %v205_v28 = vld [vmem:[%s1153_s4 + $0x30] sm:$0xff]  ;;  %v204_v30 = vld [vmem:[%s1153_s4 + $0x28] sm:$0xff]  ;;  %v203_v31 = vld [vmem:[%s1153_s4 + $0x20] sm:$0xff]  ;;  %p882_p1 = scmp.lt.s32.totalorder %s687_s5, %s687_s5 }
   0xb   :  { %769 = vmatprep.subr.mxu0 %v900_v3  ;;  %783 = vmatpush3.msra.mxu1 %v117_v13  ;;  %v202_v32 = vld [vmem:[%s1153_s4 + $0x18] sm:$0xff]  ;;  %v201_v33 = vld [vmem:[%s1153_s4 + $0x10] sm:$0xff]  ;;  %v200_v34 = vld [vmem:[%s1153_s4 + $0x8] sm:$0xff] }
   0xc   :  { %770 = vmatpush3.msra.mxu0 %v989_v8  ;;  %787 = vmatprep.subr.mxu1 %v900_v3  ;;  %v199_v35 = vld [vmem:[%s1153_s4] sm:$0xff]  ;;  %v457_v43 = vld [vmem:[%s1152_s3 + $0x28] sm:$0xff]  ;;  %v455_v48 = vld [vmem:[%s1152_s3 + $0x18] sm:$0xff] }
   0xd   :  { %771 = vmatprep.subr.mxu0 %v900_v3  ;;  %871 = vset.pattern.permute.xlu0 %v902_v42  ;;  %v456_v49 = vld [vmem:[%s1152_s3 + $0x20] sm:$0xff]  ;;  %v454_v50 = vld [vmem:[%s1152_s3 + $0x10] sm:$0xff]  ;;  %v453_v57 = vld [vmem:[%s1152_s3 + $0x8] sm:$0xff] }
   0xe   :  { %772 = vmatpush3.msra.mxu0 %v996_v9  ;;  %v452_v58 = vld [vmem:[%s1152_s3] sm:$0xff]  ;;  %s877_s3 = scalar_lea.vmem %s687_s5, 128 }
   0xf   :  { %773 = vmatprep.subr.mxu0 %v900_v3  ;;  %p878_p0 = scmp.ne.s32.totalorder %s687_s5, %s877_s3  ;;  %p883_p2 = scmp.lt.s32.totalorder %s877_s3, %s877_s3 }
  0x10   :  { %774 = vmatpush3.msra.mxu0 %v1003_v10 }
  0x11   :  { %806 = vmatprep.subr.mxu0 %v900_v3  ;;  %p884_p3 = por %p883_p2, %p882_p1 }
  0x13   :  { %p885_p4 = pnand %p884_p3, %p878_p0 }
  0x7d   :  { %v39_v16 = vpop.permute.xlu0 %38 }
  0x7e   :  { %vm40_vm3 = vcmp.eq.s32.totalorder %v36_v15, %v39_v16 }
  0x7f   :  { %v698_v18 = vsel %vm40_vm3, 1.0, %v900_v3 }
  0x80   :  { %776 = vmatmul.mubr.msk.f32.vlgmr.msra.gmra.mxu0 %vm43_vm2, %v698_v18 }
  0x81   :  { %807 = vmatpush3.msra.mxu0 %v284_v17  ;;  %822 = vmatprep.mubr.msk.f32.mxu0 %vm901_vm0, %v900_v3 }
  0x82   :  { %808 = vmatprep.subr.mxu0 %v900_v3 }
  0x83   :  { %809 = vmatpush3.msra.mxu0 %v283_v19 }
  0x84   :  { %810 = vmatprep.subr.mxu0 %v900_v3 }
  0x85   :  { %811 = vmatpush3.msra.mxu0 %v282_v20 }
  0x86   :  { %812 = vmatprep.subr.mxu0 %v900_v3 }
  0x87   :  { %813 = vmatpush3.msra.mxu0 %v281_v21 }
  0x88   :  { %814 = vmatprep.subr.mxu0 %v900_v3 }
  0x89   :  { %815 = vmatpush3.msra.mxu0 %v280_v22 }
  0x8a   :  { %816 = vmatprep.subr.mxu0 %v900_v3 }
  0x8b   :  { %817 = vmatpush3.msra.mxu0 %v279_v23 }
  0x8c   :  { %818 = vmatprep.subr.mxu0 %v900_v3 }
  0x8d   :  { %819 = vmatpush3.msra.mxu0 %v278_v24 }
  0x8e   :  { %820 = vmatprep.subr.mxu0 %v900_v3 }
  0x8f   :  { %821 = vmatpush3.msra.mxu0 %v277_v25 }
  0x90   :  { %823 = vmatmul.mubr.msk.f32.vlgmr.msra.gmra.mxu0 %vm43_vm2, %v698_v18  ;;  %844 = vmatprep.subr.mxu0 %v900_v3 }
  0x91   :  { %848 = vmatprep.mubr.msk.f32.mxu0 %vm901_vm0, %v900_v3  ;;  %845 = vmatpush3.msra.mxu0 %v455_v48 }
  0x92   :  { %846 = vmatprep.subr.mxu0 %v900_v3 }
  0x93   :  { %847 = vmatpush3.msra.mxu0 %v454_v50 }
  0x94   :  { %851 = vmatprep.subr.mxu0 %v900_v3 }
 0x140   :  { %v1063_v27 = vpop.f32.mrf.mxu0 }
 0x141   :  { %785 = vmatmul.mubr.msk.f32.vlgmr.msra.gmra.mxu1 %vm120_vm4, %v1063_v27 }
 0x142   :  { %788 = vmatpush3.msra.mxu1 %v206_v26  ;;  %v777_v29 = vpop.f32.mrf.mxu0  ;;  %803 = vmatprep.mubr.msk.f32.mxu1 %vm901_vm0, %v900_v3 }
 0x143   :  { %789 = vmatprep.subr.mxu1 %v900_v3 }
 0x144   :  { %790 = vmatpush3.msra.mxu1 %v205_v28 }
 0x145   :  { %791 = vmatprep.subr.mxu1 %v900_v3 }
 0x146   :  { %792 = vmatpush3.msra.mxu1 %v204_v30 }
 0x147   :  { %793 = vmatprep.subr.mxu1 %v900_v3 }
 0x148   :  { %794 = vmatpush3.msra.mxu1 %v203_v31 }
 0x149   :  { %795 = vmatprep.subr.mxu1 %v900_v3 }
 0x14a   :  { %796 = vmatpush3.msra.mxu1 %v202_v32 }
 0x14b   :  { %797 = vmatprep.subr.mxu1 %v900_v3 }
 0x14c   :  { %798 = vmatpush3.msra.mxu1 %v201_v33 }
 0x14d   :  { %799 = vmatprep.subr.mxu1 %v900_v3 }
 0x14e   :  { %800 = vmatpush3.msra.mxu1 %v200_v34 }
 0x14f   :  { %801 = vmatprep.subr.mxu1 %v900_v3 }
 0x150   :  { %802 = vmatpush3.msra.mxu1 %v199_v35  ;;  %v351_v36 = vpop.f32.mrf.mxu0 }
 0x151   :  { %804 = vmatmul.mubr.msk.f32.vlgmr.msra.gmra.mxu1 %vm43_vm2, %v698_v18  ;;  %825 = vmatprep.subr.mxu1 %v950_v1 }
 0x152   :  { %v824_v37 = vpop.f32.mrf.mxu0  ;;  %826 = vmatpush3.msra.mxu1 %v950_v1 }
 0x153   :  { %827 = vmatprep.subr.mxu1 %v956_v4 }
 0x154   :  { %828 = vmatpush3.msra.mxu1 %v956_v4 }
 0x155   :  { %829 = vmatprep.subr.mxu1 %v963_v5 }
 0x156   :  { %830 = vmatpush3.msra.mxu1 %v963_v5 }
 0x157   :  { %831 = vmatprep.subr.mxu1 %v973_v6 }
 0x158   :  { %832 = vmatpush3.msra.mxu1 %v973_v6 }
 0x159   :  { %833 = vmatprep.subr.mxu1 %v982_v7 }
 0x15a   :  { %834 = vmatpush3.msra.mxu1 %v982_v7 }
 0x15b   :  { %835 = vmatprep.subr.mxu1 %v989_v8 }
 0x15c   :  { %836 = vmatpush3.msra.mxu1 %v989_v8 }
 0x15d   :  { %837 = vmatprep.subr.mxu1 %v996_v9 }
 0x15e   :  { %838 = vmatpush3.msra.mxu1 %v996_v9 }
 0x15f   :  { %839 = vmatprep.subr.mxu1 %v1003_v10 }
 0x160   :  { %840 = vmatpush3.msra.mxu1 %v1003_v10 }
 0x161   :  { %858 = vmatprep.subr.mxu1 %v900_v3 }
 0x201   :  { %v194_v38 = vpop.f32.mrf.mxu1 }
 0x202   :  { %198 = vst [vmem:[%s1156_s7] sm:$0xff] %v194_v38 }
 0x203   :  { %v786_v39 = vpop.f32.mrf.mxu1 }
 0x211   :  { %v273_v40 = vpop.f32.mrf.mxu1 }
 0x212   :  { %841 = vmatprep.mubr.msk.f32.mxu1 %vm43_vm2, %v273_v40 }
 0x213   :  { %v805_v41 = vpop.f32.mrf.mxu1  ;;  %842 = vmatmul.mubr.msk.f32.vlgmr.msra.gmra.mxu1 %vm43_vm2, %v351_v36 }
 0x214   :  { %862 = vmatprep.mubr.msk.f32.mxu1 %vm901_vm0, %v900_v3  ;;  %859 = vmatpush3.msra.mxu1 %v457_v43 }
 0x215   :  { %860 = vmatprep.subr.mxu1 %v900_v3 }
 0x216   :  { %861 = vmatpush3.msra.mxu1 %v456_v49 }
 0x2d3   :  { %v843_v44 = vpop.f32.mrf.mxu1 }
 0x2d4   :  { %v437_v45 = vmax.f32 %v843_v44, 1.0 }
 0x2d5   :  { %v427_v46 = vpop.f32.mrf.mxu1 }
 0x2d6   :  { %873 = vrcp.f32 %v437_v45  ;;  %v436_v47 = vmax.f32 %v427_v46, 1.0 }
 0x2d8   :  { %875 = vrcp.f32 %v436_v47 }
 0x2e3   :  { %v874_v51 = vpop.eup %873 }
 0x2e4   :  { %447 = vperm.xlu1 %872, %v874_v51  }
 0x2e5   :  { %v876_v52 = vpop.eup %875 }
 0x2e6   :  { %442 = vperm.xlu0 %871, %v876_v52  }
 0x35f   :  { %v448_v53 = vpop.permute.xlu1 %447 }
 0x360   :  { %v451_v54 = vmul.f32 %v843_v44, %v448_v53 }
 0x361   :  { %v443_v55 = vpop.permute.xlu0 %442 }
 0x362   :  { %v450_v56 = vmul.f32 %v443_v55, %v427_v46  ;;  %863 = vmatmul.mubr.msk.f32.vlgmr.msra.gmra.mxu1 %vm458_vm5, %v451_v54 }
 0x364   :  { %849 = vmatmul.mubr.msk.f32.vlgmr.msra.gmra.mxu0 %vm458_vm5, %v450_v56 }
 0x365   :  { %852 = vmatpush3.msra.mxu0 %v453_v57  ;;  %855 = vmatprep.mubr.msk.f32.mxu0 %vm901_vm0, %v900_v3 }
 0x366   :  { %853 = vmatprep.subr.mxu0 %v900_v3 }
 0x367   :  { %854 = vmatpush3.msra.mxu0 %v452_v58 }
 0x368   :  { %856 = vmatmul.mubr.msk.f32.vlgmr.msra.gmra.mxu0 %vm458_vm5, %v1063_v27 }
 0x422   :  { %v673_v59 = vpop.f32.mrf.mxu1 }
 0x424   :  { %v528_v60 = vpop.f32.mrf.mxu0  ;;  %v864_v61 = vpop.f32.mrf.mxu1 }
 0x426   :  { %v850_v62 = vpop.f32.mrf.mxu0 }
 0x428   :  { %v600_v63 = vpop.f32.mrf.mxu0 }
 0x429   :  { %v601_v0 = vadd.f32 %v600_v63, %v528_v60 }
 0x42a   :  { %v857_v1 = vpop.f32.mrf.mxu0 }
 0x42b   :  { %v677_v2 = vadd.f32 %v673_v59, %v601_v0 }
 0x42d   :  { %v678_v4 = vmax.f32 %v677_v2, 0.0 }
 0x42f   :  { %679 = vst [vmem:[#allocation2] sm:$0xff] %v678_v4 }
 0x430   :  { %888 = shalt.err (!%p885_p4)
}
 0x431   :  { %689 = dma.vmem_to_hbm [thread:$0]  %s687_s5, 128, %s1155_s6, [#allocation3]  }
 0x432   :  { %897 = dma.done.wait [#allocation3], 128  }
 0x433   :  { %898 = vsyncadd [#allocation3], 4294967168 }
 0x434   :  { %697 = vsyncpa [#allocation3], 1 }

</bundles_post_ra>
